<compile_context>
chip_gen: v6e
topology: v6e:2x2x1
jax: 0.10.0
libtpu: 0.0.40
codegen_flags: <defaults>
</compile_context>

<pallas_src>
import functools
import math

import jax
import jax.numpy as jnp
from jax.experimental import pallas as pl
from jax.experimental.pallas import tpu as pltpu

LANE = 128
SUBLANE_BF16 = 16


def _round_up(n, m):
    return ((n + m - 1) // m) * m


def _mlp_kernel(*refs, num_layers):
    """Fused MLP on one (TB, Din) batch tile.

    refs = (x_tile, w1, b1, w2, b2, ..., wn, bn, out_tile).
    Weights are bf16, biases f32; accumulation and bias/ReLU math are f32.
    """
    x_ref = refs[0]
    o_ref = refs[-1]
    h = x_ref[...]                                  # f32 (TB, Din)
    for i in range(num_layers):
        w_ref = refs[1 + 2 * i]                     # bf16 (Din_i, Dout_i)
        b_ref = refs[2 + 2 * i]                     # f32  (1, Dout_i)
        # bf16 x bf16 on the MXU with f32 accumulation.
        h = jnp.dot(h.astype(jnp.bfloat16), w_ref[...],
                    preferred_element_type=jnp.float32)
        h = h + b_ref[...]                          # broadcast over batch rows
        if i + 1 < num_layers:
            h = jnp.maximum(h, 0.0)                 # ReLU (f32 on the VPU)
    o_ref[...] = h.astype(o_ref.dtype)


def init_net_h_params(key, input_dim, layers_dim):
    """Deterministic init matching nn.Linear's default U(-1/sqrt(fan_in), ...)."""
    dims = [input_dim] + list(layers_dim)
    params = []
    for i in range(len(layers_dim)):
        fan_in, fan_out = dims[i], dims[i + 1]
        key, kw, kb = jax.random.split(key, 3)
        bound = 1.0 / math.sqrt(fan_in)
        # Stored already transposed: (in_features, out_features).
        w_t = jax.random.uniform(kw, (fan_in, fan_out), jnp.float32,
                                 minval=-bound, maxval=bound)
        b = jax.random.uniform(kb, (fan_out,), jnp.float32,
                               minval=-bound, maxval=bound)
        params.append((w_t, b))
    return params


def pad_params(params, input_dim):
    """One-time layout prep: bf16 weights, zero-pad *hidden* widths to 128 lanes.

    The final layer's output width is left unpadded (written directly to HBM).
    Exactness of the zero padding relies on the inter-layer activation being
    ReLU: padded columns produce 0, relu(0) == 0, and the padded weight rows
    of the following layer are 0.
    """
    padded = []
    prev_in = input_dim
    n = len(params)
    for li, (w_t, b) in enumerate(params):
        din, dout = w_t.shape
        is_last = (li == n - 1)
        dout_p = dout if is_last else _round_up(dout, LANE)
        w_p = (jnp.zeros((prev_in, dout_p), jnp.bfloat16)
               .at[:din, :dout].set(w_t.astype(jnp.bfloat16)))
        b_p = jnp.zeros((1, dout_p), jnp.float32).at[0, :dout].set(b)
        padded.append((w_p, b_p))
        prev_in = dout_p
    return padded


def net_h_forward_fused(padded_params, x, out_dim, tb=256):
    """Net_h.forward as a single fused, batch-tiled Pallas kernel."""
    B, din = x.shape
    n = len(padded_params)

    # Batch tile: multiple of 16 (covers f32 (8,128) tiles and in-register
    # bf16 (16,128) activation layout), clamped to the padded batch.
    tb = max(SUBLANE_BF16, min(tb, _round_up(B, SUBLANE_BF16)))
    tb = _round_up(tb, SUBLANE_BF16)
    bp = _round_up(B, tb)
    if bp != B:
        x = jnp.zeros((bp, din), x.dtype).at[:B].set(x)

    flat_inputs = [x]
    in_specs = [pl.BlockSpec((tb, din), lambda i: (i, 0))]   # x: batch-tiled
    for w_p, b_p in padded_params:
        flat_inputs += [w_p, b_p]
        # Weights/biases: whole-array, constant block -> resident in VMEM.
        in_specs.append(pl.BlockSpec(w_p.shape, lambda i: (0, 0)))
        in_specs.append(pl.BlockSpec(b_p.shape, lambda i: (0, 0)))

    kernel = functools.partial(_mlp_kernel, num_layers=n)
    out = pl.pallas_call(
        kernel,
        out_shape=jax.ShapeDtypeStruct((bp, out_dim), x.dtype),
        grid=(bp // tb,),
        in_specs=in_specs,
        out_specs=pl.BlockSpec((tb, out_dim), lambda i: (i, 0)),
        compiler_params=pltpu.CompilerParams(
            dimension_semantics=("parallel",),     # shard batch tiles over TCs
            vmem_limit_bytes=32 * 1024 * 1024,     # safe on v5e/v6e/v7x
        ),
    )(*flat_inputs)
    return out if bp == B else out[:B]


def net_h_reference(params, x):
    """Plain-JAX f32 reference (unpadded weights) for correctness checking."""
    n = len(params)
    for i, (w_t, b) in enumerate(params):
        x = x @ w_t + b
        if i + 1 < n:
            x = jnp.maximum(x, 0.0)
    return x


if __name__ == "__main__":
    batch = 64
    input_dim = 32
    layers_dim = [64, 48, 16]

    key = jax.random.PRNGKey(0)
    key, kx = jax.random.split(key)
    x = jax.random.normal(kx, (batch, input_dim), jnp.float32)

    params = init_net_h_params(key, input_dim, layers_dim)
    padded_params = pad_params(params, input_dim)       # one-time layout prep

    # Small tile so the batch grid actually has several pipelined steps here;
    # use the default (256) for real workloads.
    out = net_h_forward_fused(padded_params, x, layers_dim[-1], tb=16)
    out = jax.block_until_ready(out)

    ref = net_h_reference(params, x)
    assert out.shape == (batch, layers_dim[-1])
    # bf16 matmul inputs -> loose tolerance vs. the f32 reference.
    assert jnp.allclose(out, ref, atol=3e-2, rtol=3e-2), (
        float(jnp.max(jnp.abs(out - ref))))

    print("KERNEL_OK")
</pallas_src>

<mosaic_0001>
module attributes {stable_mosaic.version = 11 : i64} {
  func.func @_mlp_kernel(%arg0: i32, %arg1: memref<16x32xf32, #tpu.memory_space<vmem>>, %arg2: memref<32x128xbf16, #tpu.memory_space<vmem>>, %arg3: memref<1x128xf32, #tpu.memory_space<vmem>>, %arg4: memref<128x128xbf16, #tpu.memory_space<vmem>>, %arg5: memref<1x128xf32, #tpu.memory_space<vmem>>, %arg6: memref<128x16xbf16, #tpu.memory_space<vmem>>, %arg7: memref<1x16xf32, #tpu.memory_space<vmem>>, %arg8: memref<16x16xf32, #tpu.memory_space<vmem>>) attributes {dimension_semantics = [#tpu.dimension_semantics<parallel>], iteration_bounds = array<i64: 4>, scalar_prefetch = 0 : i64, scratch_operands = 0 : i64, tpu.core_type = #tpu.core_type<tc>, window_params = [{transform_indices = @transform_0, window_bounds = array<i64: 16, 32>}, {pipeline_mode = #tpu.pipeline_mode<synchronous>, transform_indices = @transform_1, window_bounds = array<i64: 32, 128>}, {pipeline_mode = #tpu.pipeline_mode<synchronous>, transform_indices = @transform_2, window_bounds = array<i64: 1, 128>}, {pipeline_mode = #tpu.pipeline_mode<synchronous>, transform_indices = @transform_3, window_bounds = array<i64: 128, 128>}, {pipeline_mode = #tpu.pipeline_mode<synchronous>, transform_indices = @transform_4, window_bounds = array<i64: 1, 128>}, {pipeline_mode = #tpu.pipeline_mode<synchronous>, transform_indices = @transform_5, window_bounds = array<i64: 128, 16>}, {pipeline_mode = #tpu.pipeline_mode<synchronous>, transform_indices = @transform_6, window_bounds = array<i64: 1, 16>}, {transform_indices = @transform_7, window_bounds = array<i64: 16, 16>}]} {
    %c0 = arith.constant 0 : index
    %c0_0 = arith.constant 0 : index
    %0 = vector.load %arg1[%c0, %c0_0] : memref<16x32xf32, #tpu.memory_space<vmem>>, vector<16x32xf32>
    %1 = arith.truncf %0 : vector<16x32xf32> to vector<16x32xbf16>
    %c0_1 = arith.constant 0 : index
    %c0_2 = arith.constant 0 : index
    %2 = vector.load %arg2[%c0_1, %c0_2] : memref<32x128xbf16, #tpu.memory_space<vmem>>, vector<32x128xbf16>
    %cst = arith.constant dense<0.000000e+00> : vector<16x128xf32>
    %3 = tpu.matmul %1, %2, %cst {dimension_numbers = #tpu.dot_dimension_numbers<[1], [0], [0], [1], [0, 0, 1, 1], [], []>} : vector<16x32xbf16>, vector<32x128xbf16>, vector<16x128xf32> -> vector<16x128xf32>
    %c0_3 = arith.constant 0 : index
    %c0_4 = arith.constant 0 : index
    %4 = vector.load %arg3[%c0_3, %c0_4] : memref<1x128xf32, #tpu.memory_space<vmem>>, vector<1x128xf32>
    %5 = vector.broadcast %4 : vector<1x128xf32> to vector<16x128xf32>
    %6 = arith.addf %3, %5 : vector<16x128xf32>
    %cst_5 = arith.constant 0.000000e+00 : f32
    %7 = vector.broadcast %cst_5 : f32 to vector<16x128xf32>
    %8 = arith.maximumf %6, %7 : vector<16x128xf32>
    %9 = arith.truncf %8 : vector<16x128xf32> to vector<16x128xbf16>
    %c0_6 = arith.constant 0 : index
    %c0_7 = arith.constant 0 : index
    %10 = vector.load %arg4[%c0_6, %c0_7] : memref<128x128xbf16, #tpu.memory_space<vmem>>, vector<128x128xbf16>
    %cst_8 = arith.constant dense<0.000000e+00> : vector<16x128xf32>
    %11 = tpu.matmul %9, %10, %cst_8 {dimension_numbers = #tpu.dot_dimension_numbers<[1], [0], [0], [1], [0, 0, 1, 1], [], []>} : vector<16x128xbf16>, vector<128x128xbf16>, vector<16x128xf32> -> vector<16x128xf32>
    %c0_9 = arith.constant 0 : index
    %c0_10 = arith.constant 0 : index
    %12 = vector.load %arg5[%c0_9, %c0_10] : memref<1x128xf32, #tpu.memory_space<vmem>>, vector<1x128xf32>
    %13 = vector.broadcast %12 : vector<1x128xf32> to vector<16x128xf32>
    %14 = arith.addf %11, %13 : vector<16x128xf32>
    %cst_11 = arith.constant 0.000000e+00 : f32
    %15 = vector.broadcast %cst_11 : f32 to vector<16x128xf32>
    %16 = arith.maximumf %14, %15 : vector<16x128xf32>
    %17 = arith.truncf %16 : vector<16x128xf32> to vector<16x128xbf16>
    %c0_12 = arith.constant 0 : index
    %c0_13 = arith.constant 0 : index
    %18 = vector.load %arg6[%c0_12, %c0_13] : memref<128x16xbf16, #tpu.memory_space<vmem>>, vector<128x16xbf16>
    %cst_14 = arith.constant dense<0.000000e+00> : vector<16x16xf32>
    %19 = tpu.matmul %17, %18, %cst_14 {dimension_numbers = #tpu.dot_dimension_numbers<[1], [0], [0], [1], [0, 0, 1, 1], [], []>} : vector<16x128xbf16>, vector<128x16xbf16>, vector<16x16xf32> -> vector<16x16xf32>
    %c0_15 = arith.constant 0 : index
    %c0_16 = arith.constant 0 : index
    %20 = vector.load %arg7[%c0_15, %c0_16] : memref<1x16xf32, #tpu.memory_space<vmem>>, vector<1x16xf32>
    %21 = vector.broadcast %20 : vector<1x16xf32> to vector<16x16xf32>
    %22 = arith.addf %19, %21 : vector<16x16xf32>
    %c0_17 = arith.constant 0 : index
    %c0_18 = arith.constant 0 : index
    %23 = vector.load %arg8[%c0_17, %c0_18] : memref<16x16xf32, #tpu.memory_space<vmem>>, vector<16x16xf32>
    tpu.vector_store %arg8[%c0_17, %c0_18], %22 {strides = array<i32>} : memref<16x16xf32, #tpu.memory_space<vmem>>, vector<16x16xf32>,
    return
  }
  func.func @transform_0(%arg0: i32) -> (i32, i32) {
    %c0_i32 = arith.constant 0 : i32
    %c0_i32_0 = arith.constant 0 : i32
    return %arg0, %c0_i32 : i32, i32
  }
  func.func @transform_1(%arg0: i32) -> (i32, i32) {
    %c0_i32 = arith.constant 0 : i32
    %c0_i32_0 = arith.constant 0 : i32
    %c0_i32_1 = arith.constant 0 : i32
    return %c0_i32, %c0_i32_0 : i32, i32
  }
  func.func @transform_2(%arg0: i32) -> (i32, i32) {
    %c0_i32 = arith.constant 0 : i32
    %c0_i32_0 = arith.constant 0 : i32
    %c0_i32_1 = arith.constant 0 : i32
    return %c0_i32, %c0_i32_0 : i32, i32
  }
  func.func @transform_3(%arg0: i32) -> (i32, i32) {
    %c0_i32 = arith.constant 0 : i32
    %c0_i32_0 = arith.constant 0 : i32
    %c0_i32_1 = arith.constant 0 : i32
    return %c0_i32, %c0_i32_0 : i32, i32
  }
  func.func @transform_4(%arg0: i32) -> (i32, i32) {
    %c0_i32 = arith.constant 0 : i32
    %c0_i32_0 = arith.constant 0 : i32
    %c0_i32_1 = arith.constant 0 : i32
    return %c0_i32, %c0_i32_0 : i32, i32
  }
  func.func @transform_5(%arg0: i32) -> (i32, i32) {
    %c0_i32 = arith.constant 0 : i32
    %c0_i32_0 = arith.constant 0 : i32
    %c0_i32_1 = arith.constant 0 : i32
    return %c0_i32, %c0_i32_0 : i32, i32
  }
  func.func @transform_6(%arg0: i32) -> (i32, i32) {
    %c0_i32 = arith.constant 0 : i32
    %c0_i32_0 = arith.constant 0 : i32
    %c0_i32_1 = arith.constant 0 : i32
    return %c0_i32, %c0_i32_0 : i32, i32
  }
  func.func @transform_7(%arg0: i32) -> (i32, i32) {
    %c0_i32 = arith.constant 0 : i32
    %c0_i32_0 = arith.constant 0 : i32
    return %arg0, %c0_i32 : i32, i32
  }
}

</mosaic_0001>

<bundles_post_ra>
// kernel: tpu_custom_call.1
= control target key start
LH: loop header
LB: loop body
LE: loop exit
PB: predicated region body
PF: predicated region fallthrough
CT: control target
= control target key end

     0   :  { %s823_s24 = smov 0   ;;  %s934_s0 = inlined_call_operand.vmem [shape: f32[64,32], index: 0, kind: input, shape index: {}]   ;;  %s935_s1 = inlined_call_operand.vmem [shape: bf16[32,128], index: 1, kind: input, shape index: {}]   ;;  %s936_s2 = inlined_call_operand.vmem [shape: f32[1,128], index: 2, kind: input, shape index: {}]   ;;  %s937_s3 = inlined_call_operand.vmem [shape: bf16[128,128], index: 3, kind: input, shape index: {}]   ;;  %s938_s4 = inlined_call_operand.vmem [shape: f32[1,128], index: 4, kind: input, shape index: {}]   ;;  %s939_s5 = inlined_call_operand.vmem [shape: bf16[128,16], index: 5, kind: input, shape index: {}]   ;;  %s940_s6 = inlined_call_operand.vmem [shape: f32[1,16], index: 6, kind: input, shape index: {}]   ;;  %s941_s7 = inlined_call_operand.vmem [shape: f32[64,16], index: 7, kind: output, shape index: {}]  }
   0x1 LB: > { %s643_s25 = sadd.s32 4294967295, %s779_s24   ;;  %p647_p0 = scmp.ge.s32.totalorder %s779_s24, 1  ;;  %s779_s24 = sphi %s823_s24, %s17_s24  }
   0x2   : > { %p238_p1 = scmp.lt.s32.totalorder %s779_s24, 5 }
   0x4   : > { %p239_p2 = pnand %p647_p0, %p238_p1 }
   0x5   : > { %s648_s30 = sshll.u32 (!%p239_p2), %s643_s25, 1 }
   0x6   : > { %242 = sbr.rel (%p239_p2) target bundleno = 626 (0x272), region = 48  ;;  %p271_p3 = scmp.lt.s32.totalorder (!%p239_p2), %s648_s30, 7 }
   0xb   : > { %v755_v0 = vld [vmem:[%s935_s1 + $0x8] sm:$0xff]   ;;  %v781_v1 = vmov 0.0   ;;  %v756_v2 = vld [vmem:[%s935_s1] sm:$0xff]   ;;  %vm782_vm0 = vmmov 0   ;;  %v757_v3 = vld [vmem:[%s937_s3 + $0x38] sm:$0xff]   ;;  %s943_s30 = smov (!%p271_p3, %s648_s30), 7 }
   0xc   : > { %697 = vmatprep.subr.bf16.mxu0 %v781_v1  ;;  %705 = vmatprep.subr.bf16.mxu1 %v781_v1  ;;  %v758_v4 = vld [vmem:[%s937_s3 + $0x30] sm:$0xff]   ;;  %s649_s12 = sshll.u32 %s943_s30, 3  ;;  %v759_v5 = vld [vmem:[%s937_s3 + $0x28] sm:$0xff]   ;;  %vm309_vm1 = vcmask 261120   ;;  %v760_v9 = vld [vmem:[%s937_s3 + $0x20] sm:$0xff]   ;;  %vm584_vm2 = vcmask 130048  }
   0xd   : > { %698 = vmatpush3.bf16.msra.mxu0 %v755_v0  ;;  %701 = vmatprep.mubr.msk.bf16.mxu0 %vm782_vm0, %v781_v1  ;;  %s274_s17 = scalar_lea.vmem %s934_s0, %s649_s12  ;;  %v761_v10 = vld [vmem:[%s937_s3 + $0x18] sm:$0xff]   ;;  %v762_v11 = vld [vmem:[%s937_s3 + $0x10] sm:$0xff]   ;;  %v763_v12 = vld [vmem:[%s937_s3 + $0x8] sm:$0xff]   ;;  %s280_s11 = scalar_lea.vmem %s941_s7, %s649_s12 }
   0xe   : > { %699 = vmatprep.subr.bf16.mxu0 %v781_v1  ;;  %721 = vmatprep.mubr.msk.bf16.mxu1 %vm782_vm0, %v781_v1  ;;  %v283_v6 = vld [vmem:[%s274_s17] sm:$0xff]  ;;  %v284_v7 = vld [vmem:[%s274_s17 + $0x8] sm:$0xff]  ;;  %v765_v14 = vld [vmem:[%s939_s5 + $0x38] sm:$0xff]  }
   0xf   : > { %706 = vmatpush3.bf16.msra.mxu1 %v757_v3  ;;  %v285_v8 = vpack.c.bf16 %v284_v7, %v283_v6  ;;  %v764_v13 = vld [vmem:[%s937_s3] sm:$0xff]   ;;  %v766_v15 = vld [vmem:[%s939_s5 + $0x30] sm:$0xff]   ;;  %v767_v16 = vld [vmem:[%s939_s5 + $0x28] sm:$0xff]  }
  0x10   : > { %707 = vmatprep.subr.bf16.mxu1 %v781_v1  ;;  %v768_v17 = vld [vmem:[%s939_s5 + $0x20] sm:$0xff]   ;;  %v769_v18 = vld [vmem:[%s939_s5 + $0x18] sm:$0xff]   ;;  %v770_v29 = vld [vmem:[%s939_s5 + $0x10] sm:$0xff]  }
  0x11   : > { %700 = vmatpush3.bf16.msra.mxu0 %v756_v2  ;;  %v652_v19 = vld [vmem:[%s936_s2] ss:$0 sm:$0xff]  ;;  %v771_v30 = vld [vmem:[%s939_s5 + $0x8] sm:$0xff]  }
  0x12   : > { %725 = vmatprep.subr.bf16.mxu0 %v781_v1  ;;  %v772_v31 = vld [vmem:[%s939_s5] sm:$0xff]  }
  0x13   : > { %708 = vmatpush3.bf16.msra.mxu1 %v758_v4  ;;  %v656_v32 = vld [vmem:[%s938_s4] ss:$0 sm:$0xff] }
  0x14   : > { %709 = vmatprep.subr.bf16.mxu1 %v781_v1  ;;  %702 = vmatmul.mubr.msk.bf16.vlgmr.msra.gmra.mxu0 %vm309_vm1, %v285_v8  ;;  %v665_v42 = vld [vmem:[%s940_s6] ss:$0 sm:$0xff] }
  0x15   : > { %741 = vmatprep.mubr.msk.bf16.mxu0 %vm782_vm0, %v781_v1  ;;  %726 = vmatpush3.bf16.msra.mxu0 %v765_v14 }
  0x16   : > { %727 = vmatprep.subr.bf16.mxu0 %v781_v1 }
  0x17   : > { %710 = vmatpush3.bf16.msra.mxu1 %v759_v5 }
  0x18   : > { %711 = vmatprep.subr.bf16.mxu1 %v781_v1 }
  0x19   : > { %728 = vmatpush3.bf16.msra.mxu0 %v766_v15 }
  0x1a   : > { %729 = vmatprep.subr.bf16.mxu0 %v781_v1 }
  0x1b   : > { %712 = vmatpush3.bf16.msra.mxu1 %v760_v9 }
  0x1c   : > { %713 = vmatprep.subr.bf16.mxu1 %v781_v1 }
  0x1d   : > { %730 = vmatpush3.bf16.msra.mxu0 %v767_v16 }
  0x1e   : > { %731 = vmatprep.subr.bf16.mxu0 %v781_v1 }
  0x1f   : > { %714 = vmatpush3.bf16.msra.mxu1 %v761_v10 }
  0x20   : > { %715 = vmatprep.subr.bf16.mxu1 %v781_v1 }
  0x21   : > { %732 = vmatpush3.bf16.msra.mxu0 %v768_v17 }
  0x22   : > { %733 = vmatprep.subr.bf16.mxu0 %v781_v1 }
  0x23   : > { %716 = vmatpush3.bf16.msra.mxu1 %v762_v11 }
  0x24   : > { %717 = vmatprep.subr.bf16.mxu1 %v781_v1 }
  0x25   : > { %734 = vmatpush3.bf16.msra.mxu0 %v769_v18 }
  0x26   : > { %735 = vmatprep.subr.bf16.mxu0 %v781_v1 }
  0x27   : > { %718 = vmatpush3.bf16.msra.mxu1 %v763_v12 }
  0x28   : > { %719 = vmatprep.subr.bf16.mxu1 %v781_v1 }
  0x29   : > { %736 = vmatpush3.bf16.msra.mxu0 %v770_v29 }
  0x2a   : > { %737 = vmatprep.subr.bf16.mxu0 %v781_v1 }
  0x2b   : > { %720 = vmatpush3.bf16.msra.mxu1 %v764_v13 }
  0x2d   : > { %738 = vmatpush3.bf16.msra.mxu0 %v771_v30 }
  0x2e   : > { %739 = vmatprep.subr.bf16.mxu0 %v781_v1 }
  0x31   : > { %740 = vmatpush3.bf16.msra.mxu0 %v772_v31 }
  0xd4   : > { %v347_v20 = vpop.f32.mrf.mxu0 }
  0xd5   : > { %v348_v22 = vadd.f32 %v652_v19, %v347_v20 }
  0xd6   : > { %v703_v21 = vpop.f32.mrf.mxu0 }
  0xd7   : > { %v354_v26 = vmax.f32 %v348_v22, 0.0 }
  0xd8   : > { %v350_v23 = vpop.f32.mrf.mxu0 }
  0xd9   : > { %v351_v24 = vadd.f32 %v652_v19, %v350_v23 }
  0xda   : > { %v704_v25 = vpop.f32.mrf.mxu0 }
  0xdb   : > { %v355_v27 = vmax.f32 %v351_v24, 0.0 }
  0xdd   : > { %v356_v28 = vpack.c.bf16 %v355_v27, %v354_v26 }
  0xdf   : > { %722 = vmatmul.mubr.bf16.vlgmr.msra.gmra.mxu1 %v356_v28 }
 0x19f   : > { %v462_v33 = vpop.f32.mrf.mxu1 }
 0x1a0   : > { %v463_v35 = vadd.f32 %v656_v32, %v462_v33 }
 0x1a1   : > { %v723_v34 = vpop.f32.mrf.mxu1 }
 0x1a2   : > { %v469_v39 = vmax.f32 %v463_v35, 0.0 }
 0x1a3   : > { %v465_v36 = vpop.f32.mrf.mxu1 }
 0x1a4   : > { %v466_v37 = vadd.f32 %v656_v32, %v465_v36 }
 0x1a5   : > { %v724_v38 = vpop.f32.mrf.mxu1 }
 0x1a6   : > { %v470_v40 = vmax.f32 %v466_v37, 0.0 }
 0x1a8   : > { %v471_v41 = vpack.c.bf16 %v470_v40, %v469_v39 }
 0x1aa   : > { %742 = vmatmul.mubr.bf16.vlgmr.msra.gmra.mxu0 %v471_v41 }
 0x26a   : > { %v577_v43 = vpop.f32.mrf.mxu0 }
 0x26b   : > { %v578_v44 = vadd.f32 %v665_v42, %v577_v43 }
 0x26c   : > { %v743_v45 = vpop.f32.mrf.mxu0 }
 0x26d   : > { %585 = vst.msk [vmem:[%s280_s11] sm:$0xff] %vm584_vm2, %v578_v44 }
 0x26e   : > { %v580_v46 = vpop.f32.mrf.mxu0 }
 0x26f   : > { %v581_v47 = vadd.f32 %v665_v42, %v580_v46 }
 0x270   : > { %v744_v48 = vpop.f32.mrf.mxu0 }
 0x271   : > { %586 = vst.msk [vmem:[%s280_s11 + $0x8] sm:$0xff] %vm584_vm2, %v581_v47 }
 0x272 PF: > { %s17_s24 = sadd.s32 1, %s779_s24  }
 0x273   : > { %p14_p4 = scmp.ge.s32.totalorder %s17_s24, 6  }
 0x275   :  { %16 = sbr.rel (!%p14_p4) target bundleno = 1 (0x1), region = 78 }

</bundles_post_ra>
